<compile_context>
chip_gen: v7x
topology: tpu7x:2x2x1
jax: 0.10.0
libtpu: 0.0.40
codegen_flags: <defaults>
</compile_context>

<pallas_src>
import math
import functools

import jax
import jax.numpy as jnp
from jax.experimental import pallas as pl
from jax.experimental.pallas import tpu as pltpu


LANE = 128                      # lane (last-dim) tile width
SUBLANE = 8                     # sublane (second-to-last dim) tile height
BATCH_TILE = 1024               # max batch-tile rows in the gridded path
VMEM_LIMIT_BYTES = 32 << 20     # scoped VMEM request (safe on v5e/v6e/v7x)
SINGLE_CALL_BUDGET = 24 << 20   # resident-set budget before we must tile
MIN_ROWS_GRID_2CORE = 4096      # rows before a 2-TC split beats 1 resident call


def _round_up(n, m):
    return ((n + m - 1) // m) * m


def _has_two_tensorcores():
    """True on chips where one pallas_call can span 2 TensorCores
    (v4 / v5p megacore, v7x).  Heuristic on device_kind; falls back to False
    (functionally identical, just no 2-way batch split)."""
    try:
        kind = jax.devices()[0].device_kind.lower()
    except Exception:
        return False
    return any(tag in kind for tag in ("v4", "v5p", "7x", "v7"))


# ----------------------------------------------------------------------------
# Kernel: fused  Linear -> ReLU -> Linear  on one (batch-tile) block
# ----------------------------------------------------------------------------
def mlp_kernel(x_ref, w1_ref, b1_ref, w2_ref, b2_ref, o_ref):
    # x_ref : (TB, I)    w1_ref : (I, Hp)   b1_ref : (1, Hp)
    # w2_ref: (Hp, Op)   b2_ref : (1, Op)   o_ref  : (TB, Op)
    x = x_ref[...]
    h = jnp.dot(x, w1_ref[...], preferred_element_type=jnp.float32) + b1_ref[...]
    h = jnp.maximum(h, 0.0)                                  # ReLU (f32)
    h = h.astype(w2_ref.dtype)                               # no-op in f32 mode
    out = jnp.dot(h, w2_ref[...], preferred_element_type=jnp.float32) + b2_ref[...]
    o_ref[...] = out.astype(o_ref.dtype)


# ----------------------------------------------------------------------------
# One-time parameter prep (keep OUT of the per-step hot loop)
# ----------------------------------------------------------------------------
def prepare_params(w1, b1, w2, b2, compute_dtype=jnp.float32):
    """torch layout  w1:(H,I) b1:(H,) w2:(O,H) b2:(O,)  ->  kernel layout
    w1_p:(I,Hp)  b1_p:(1,Hp)  w2_p:(Hp,Op)  b2_p:(1,Op).
    Only the hidden dim is padded to a lane multiple (exact: padded hidden
    columns stay 0 through ReLU and padded W2 rows contribute nothing).
    The input feature dim is left unpadded; the output dim is left unpadded
    when small (<= 64) to avoid writeback padding and a post-kernel slice.
    Biases stay f32 even when compute_dtype=bf16."""
    H, I = w1.shape
    O, _ = w2.shape
    Hp = _round_up(H, LANE)
    Op = O if O <= 64 else _round_up(O, LANE)

    w1_p = jnp.zeros((I, Hp), compute_dtype).at[:, :H].set(
        jnp.transpose(w1).astype(compute_dtype))
    b1_p = jnp.zeros((1, Hp), jnp.float32).at[0, :H].set(b1.astype(jnp.float32))
    w2_p = jnp.zeros((Hp, Op), compute_dtype).at[:H, :O].set(
        jnp.transpose(w2).astype(compute_dtype))
    b2_p = jnp.zeros((1, Op), jnp.float32).at[0, :O].set(b2.astype(jnp.float32))
    return (w1_p, b1_p, w2_p, b2_p)


def _choose_tile(Bp, I, Op, x_itemsize, weight_bytes, two_cores):
    """Pick a batch tile: as big as VMEM allows (fewer grid steps), even step
    count on 2-TC chips so both TensorCores get balanced work."""
    # VMEM cap: double-buffered x tile + out tile + resident weights.
    per_row = 2 * (I * x_itemsize + Op * 4)
    avail = max(SINGLE_CALL_BUDGET - weight_bytes, SUBLANE * per_row)
    vmem_max_rows = max(SUBLANE, (avail // per_row) // SUBLANE * SUBLANE)

    if two_cores:
        n_steps = max(2, pl.cdiv(Bp, BATCH_TILE))
        if n_steps % 2:
            n_steps += 1
        tile = _round_up(pl.cdiv(Bp, n_steps), SUBLANE)
    else:
        tile = _round_up(Bp, SUBLANE)
    return min(tile, BATCH_TILE, vmem_max_rows)


# ----------------------------------------------------------------------------
# Forward wrapper
# ----------------------------------------------------------------------------
@functools.partial(jax.jit, static_argnames=("out_features", "force_grid"))
def network_forward(x, params, out_features, force_grid=False):
    """x: (B, I) f32.  params: output of prepare_params.  Returns (B, O) f32."""
    w1_p, b1_p, w2_p, b2_p = params
    B, I = x.shape
    _, Hp = w1_p.shape
    _, Op = w2_p.shape

    x = x.astype(w1_p.dtype)
    x_itemsize = jnp.dtype(x.dtype).itemsize
    weight_bytes = sum(int(a.size) * jnp.dtype(a.dtype).itemsize for a in params)

    # Pad batch to the sublane multiple only (no feature-dim padding).
    Bp = _round_up(max(B, SUBLANE), SUBLANE)
    x_p = jnp.pad(x, ((0, Bp - B), (0, 0))) if Bp != B else x

    # Path decision (trace-time; shapes are static under jit):
    #  * single-TC chips: one resident call until VMEM budget is threatened
    #    (a serial grid is pure per-step overhead there);
    #  * 2-TC chips: batch-tiled "parallel" grid once there's enough work.
    two_cores = _has_two_tensorcores()
    resident_bytes = Bp * I * x_itemsize + Bp * Op * 4 + weight_bytes
    use_grid = bool(force_grid
                    or resident_bytes > SINGLE_CALL_BUDGET
                    or (two_cores and Bp >= MIN_ROWS_GRID_2CORE))

    if not use_grid:
        # Small/medium problem: single invocation, no grid, no pipeline
        # overhead; whole operands resident in VMEM for the call.
        out_p = pl.pallas_call(
            mlp_kernel,
            out_shape=jax.ShapeDtypeStruct((Bp, Op), jnp.float32),
            in_specs=[pl.BlockSpec(memory_space=pltpu.MemorySpace.VMEM)] * 5,
            out_specs=pl.BlockSpec(memory_space=pltpu.MemorySpace.VMEM),
            compiler_params=pltpu.CompilerParams(
                vmem_limit_bytes=VMEM_LIMIT_BYTES),
        )(x_p, w1_p, b1_p, w2_p, b2_p)
    else:
        # Batch-tiled grid: rows sharded over a parallel axis (both TCs on
        # v7x / megacore get work).  Weights/biases use constant index maps
        # and stay resident across steps.  Ragged last block is masked by
        # Pallas; safe because rows are independent and [:B] drops the tail.
        tile = _choose_tile(Bp, I, Op, x_itemsize, weight_bytes, two_cores)
        grid = (pl.cdiv(Bp, tile),)
        out_p = pl.pallas_call(
            mlp_kernel,
            out_shape=jax.ShapeDtypeStruct((Bp, Op), jnp.float32),
            grid=grid,
            in_specs=[
                pl.BlockSpec((tile, I), lambda i: (i, 0)),
                pl.BlockSpec((I, Hp), lambda i: (0, 0)),
                pl.BlockSpec((1, Hp), lambda i: (0, 0)),
                pl.BlockSpec((Hp, Op), lambda i: (0, 0)),
                pl.BlockSpec((1, Op), lambda i: (0, 0)),
            ],
            out_specs=pl.BlockSpec((tile, Op), lambda i: (i, 0)),
            compiler_params=pltpu.CompilerParams(
                dimension_semantics=("parallel",),
                vmem_limit_bytes=VMEM_LIMIT_BYTES),
        )(x_p, w1_p, b1_p, w2_p, b2_p)

    # Padded batch rows hold relu(b1)@w2+b2 garbage -- they MUST be sliced
    # away here (and must never be reduced/accumulated over the batch).
    return out_p[:B, :out_features]


# ----------------------------------------------------------------------------
# Deterministic parameter init matching the PyTorch module:
#   w1: xavier_uniform_(gain=1),  bias = 0
#   w2: xavier_uniform_(gain=0.1), bias = 0   (noisy=False -> plain nn.Linear)
# ----------------------------------------------------------------------------
def xavier_uniform(key, shape, gain):
    fan_out, fan_in = shape
    bound = gain * math.sqrt(6.0 / (fan_in + fan_out))
    return jax.random.uniform(key, shape, jnp.float32, -bound, bound)


def make_params(key, input_size, hidden_size, output_size):
    k1, k2 = jax.random.split(key)
    w1 = xavier_uniform(k1, (hidden_size, input_size), gain=1.0)
    b1 = jnp.zeros((hidden_size,), jnp.float32)
    w2 = xavier_uniform(k2, (output_size, hidden_size), gain=0.1)
    b2 = jnp.zeros((output_size,), jnp.float32)
    return w1, b1, w2, b2
    # TODO(synk): NoisyLinear (noisy=True) noise sampling not implemented; the
    # reference Network is exercised with noisy=False (plain nn.Linear).


if __name__ == "__main__":
    key = jax.random.PRNGKey(0)
    kx, kp, kb = jax.random.split(key, 3)

    batch, input_size, hidden_size, output_size = 2, 16, 32, 8
    x = jax.random.normal(kx, (batch, input_size), jnp.float32)
    w1, b1, w2, b2 = make_params(kp, input_size, hidden_size, output_size)

    params = prepare_params(w1, b1, w2, b2)      # one-time, outside hot loop

    # --- small-batch path (single resident call, no grid) ---
    out = network_forward(x, params, out_features=output_size)
    out = jax.block_until_ready(out)
    ref = jnp.maximum(x @ w1.T + b1, 0.0) @ w2.T + b2
    assert out.shape == (batch, output_size)
    assert jnp.allclose(out, ref, atol=1e-5, rtol=1e-5)

    # --- batch-tiled grid path (forced; ragged non-multiple-of-8 batch) ---
    xb = jax.random.normal(kb, (2500, input_size), jnp.float32)
    ref_b = jnp.maximum(xb @ w1.T + b1, 0.0) @ w2.T + b2
    out_b = network_forward(xb, params, out_features=output_size, force_grid=True)
    out_b = jax.block_until_ready(out_b)
    assert out_b.shape == (2500, output_size)
    assert jnp.allclose(out_b, ref_b, atol=1e-5, rtol=1e-5)

    # --- auto path selection for the larger batch (chip-dependent) ---
    out_c = network_forward(xb, params, out_features=output_size)
    out_c = jax.block_until_ready(out_c)
    assert jnp.allclose(out_c, ref_b, atol=1e-5, rtol=1e-5)

    print("KERNEL_OK")
</pallas_src>

<mosaic_0001>
module attributes {stable_mosaic.version = 11 : i64} {
  func.func @mlp_kernel(%arg0: memref<8x16xf32, #tpu.memory_space<vmem>>, %arg1: memref<16x128xf32, #tpu.memory_space<vmem>>, %arg2: memref<1x128xf32, #tpu.memory_space<vmem>>, %arg3: memref<128x8xf32, #tpu.memory_space<vmem>>, %arg4: memref<1x8xf32, #tpu.memory_space<vmem>>, %arg5: memref<8x8xf32, #tpu.memory_space<vmem>>) attributes {dimension_semantics = [], scalar_prefetch = 0 : i64, scratch_operands = 0 : i64, tpu.core_type = #tpu.core_type<tc>} {
    %c0 = arith.constant 0 : index
    %c0_0 = arith.constant 0 : index
    %0 = vector.load %arg0[%c0, %c0_0] : memref<8x16xf32, #tpu.memory_space<vmem>>, vector<8x16xf32>
    %c0_1 = arith.constant 0 : index
    %c0_2 = arith.constant 0 : index
    %1 = vector.load %arg1[%c0_1, %c0_2] : memref<16x128xf32, #tpu.memory_space<vmem>>, vector<16x128xf32>
    %cst = arith.constant dense<0.000000e+00> : vector<8x128xf32>
    %2 = tpu.matmul %0, %1, %cst {dimension_numbers = #tpu.dot_dimension_numbers<[1], [0], [0], [1], [0, 0, 1, 1], [], []>} : vector<8x16xf32>, vector<16x128xf32>, vector<8x128xf32> -> vector<8x128xf32>
    %c0_3 = arith.constant 0 : index
    %c0_4 = arith.constant 0 : index
    %3 = vector.load %arg2[%c0_3, %c0_4] : memref<1x128xf32, #tpu.memory_space<vmem>>, vector<1x128xf32>
    %4 = vector.broadcast %3 : vector<1x128xf32> to vector<8x128xf32>
    %5 = arith.addf %2, %4 : vector<8x128xf32>
    %cst_5 = arith.constant 0.000000e+00 : f32
    %6 = vector.broadcast %cst_5 : f32 to vector<8x128xf32>
    %7 = arith.maximumf %5, %6 : vector<8x128xf32>
    %c0_6 = arith.constant 0 : index
    %c0_7 = arith.constant 0 : index
    %8 = vector.load %arg3[%c0_6, %c0_7] : memref<128x8xf32, #tpu.memory_space<vmem>>, vector<128x8xf32>
    %cst_8 = arith.constant dense<0.000000e+00> : vector<8x8xf32>
    %9 = tpu.matmul %7, %8, %cst_8 {dimension_numbers = #tpu.dot_dimension_numbers<[1], [0], [0], [1], [0, 0, 1, 1], [], []>} : vector<8x128xf32>, vector<128x8xf32>, vector<8x8xf32> -> vector<8x8xf32>
    %c0_9 = arith.constant 0 : index
    %c0_10 = arith.constant 0 : index
    %10 = vector.load %arg4[%c0_9, %c0_10] : memref<1x8xf32, #tpu.memory_space<vmem>>, vector<1x8xf32>
    %11 = vector.broadcast %10 : vector<1x8xf32> to vector<8x8xf32>
    %12 = arith.addf %9, %11 : vector<8x8xf32>
    %c0_11 = arith.constant 0 : index
    %c0_12 = arith.constant 0 : index
    %13 = vector.load %arg5[%c0_11, %c0_12] : memref<8x8xf32, #tpu.memory_space<vmem>>, vector<8x8xf32>
    tpu.vector_store %arg5[%c0_11, %c0_12], %12 {strides = array<i32>} : memref<8x8xf32, #tpu.memory_space<vmem>>, vector<8x8xf32>,
    return
  }
}

</mosaic_0001>

<bundles_post_ra>
// kernel: network_forward.1
= control target key start
LH: loop header
LB: loop body
LE: loop exit
PB: predicated region body
PF: predicated region fallthrough
CT: control target
= control target key end

     0   :  { %v299_v0 = vmov 0.0|0.0   ;;  %vm300_vm0 = vmmov 0   ;;  %v301_v3 = vmov 0.0   ;;  %vm30_vm1 = vcmask 130048   ;;  %s398_s1 = inlined_call_operand.vmem [shape: f32[16,128], index: 1, kind: input, shape index: {}]   ;;  %s399_s3 = inlined_call_operand.vmem [shape: f32[128,8], index: 3, kind: input, shape index: {}]   ;;  %s400_s0 = inlined_call_operand.vmem [shape: f32[8,16], index: 0, kind: input, shape index: {}]   ;;  %s401_s2 = inlined_call_operand.vmem [shape: f32[1,128], index: 2, kind: input, shape index: {}]   ;;  %s402_s4 = inlined_call_operand.vmem [shape: f32[1,8], index: 4, kind: input, shape index: {}]   ;;  %s403_s5 = inlined_call_operand.vmem [shape: f32[8,8], index: 5, kind: output, shape index: {}]  }
   0x1   :  { %269 = vmatprep.subr.bf16.mxu0 %v299_v0  ;;  %v21_v1 = vld [vmem:[%s398_s1] sm:$0xff]  ;;  %v22_v2 = vld [vmem:[%s398_s1 + $0x8] sm:$0xff]  ;;  %231 = vmatprep.mubr.msk.f32.mxu0 %vm300_vm0, %v301_v3  ;;  %v107_v7 = vld [vmem:[%s399_s3 + $0x10] sm:$0xff]  ;;  %vm198_vm2 = vcmask 64512  }
   0x2   :  { %v270_v4 = vpack.c.bf16 %v22_v2, %v21_v1  ;;  %272 = vmatprep.subr.bf16.mxu1 %v299_v0  ;;  %v105_v5 = vld [vmem:[%s399_s3] sm:$0xff]  ;;  %v106_v6 = vld [vmem:[%s399_s3 + $0x8] sm:$0xff]  ;;  %266 = vmatprep.mubr.msk.f32.mxu1 %vm300_vm0, %v301_v3  ;;  %v108_v9 = vld [vmem:[%s399_s3 + $0x18] sm:$0xff] }
   0x3   :  { %v273_v8 = vpack.c.bf16 %v106_v6, %v105_v5  ;;  %v20_v10 = vld [vmem:[%s400_s0] sm:$0xff]  ;;  %v276_v11 = vpack.c.bf16 %v108_v9, %v107_v7  ;;  %v110_v13 = vld [vmem:[%s399_s3 + $0x28] sm:$0xff]  ;;  %v111_v15 = vld [vmem:[%s399_s3 + $0x30] sm:$0xff] }
   0x4   :  { %271 = vmatpush3.bf16.msra.mxu0 %v270_v4  ;;  %v109_v12 = vld [vmem:[%s399_s3 + $0x20] sm:$0xff]  ;;  %v112_v16 = vld [vmem:[%s399_s3 + $0x38] sm:$0xff]  ;;  %v114_v19 = vld [vmem:[%s399_s3 + $0x48] sm:$0xff] }
   0x5   :  { %274 = vmatpush3.bf16.msra.mxu1 %v273_v8  ;;  %v279_v14 = vpack.c.bf16 %v110_v13, %v109_v12  ;;  %v282_v17 = vpack.c.bf16 %v112_v16, %v111_v15  ;;  %v113_v18 = vld [vmem:[%s399_s3 + $0x40] sm:$0xff]  ;;  %v115_v21 = vld [vmem:[%s399_s3 + $0x50] sm:$0xff]  ;;  %v116_v22 = vld [vmem:[%s399_s3 + $0x58] sm:$0xff] }
   0x6   :  { %275 = vmatprep.subr.bf16.mxu1 %v299_v0  ;;  %v285_v20 = vpack.c.bf16 %v114_v19, %v113_v18  ;;  %v288_v23 = vpack.c.bf16 %v116_v22, %v115_v21  ;;  %v117_v24 = vld [vmem:[%s399_s3 + $0x60] sm:$0xff]  ;;  %v118_v25 = vld [vmem:[%s399_s3 + $0x68] sm:$0xff]  ;;  %v119_v27 = vld [vmem:[%s399_s3 + $0x70] sm:$0xff] }
   0x7   :  { %232 = vmatmul.mubr.msk.f32.vlgmr.msra.gmra.mrb[0].mxu0 %vm30_vm1, %v20_v10  ;;  %v291_v26 = vpack.c.bf16 %v118_v25, %v117_v24  ;;  %v120_v28 = vld [vmem:[%s399_s3 + $0x78] sm:$0xff]  ;;  %v204_v30 = vld [vmem:[%s401_s2] ss:$0 sm:$0xff] }
   0x8   :  { %v294_v29 = vpack.c.bf16 %v120_v28, %v119_v27  ;;  %v206_v35 = vld [vmem:[%s402_s4] ss:$0 sm:$0xff] }
   0x9   :  { %277 = vmatpush3.bf16.msra.mxu1 %v276_v11 }
   0xa   :  { %278 = vmatprep.subr.bf16.mxu1 %v299_v0 }
   0xd   :  { %280 = vmatpush3.bf16.msra.mxu1 %v279_v14 }
   0xe   :  { %281 = vmatprep.subr.bf16.mxu1 %v299_v0 }
  0x11   :  { %283 = vmatpush3.bf16.msra.mxu1 %v282_v17 }
  0x12   :  { %284 = vmatprep.subr.bf16.mxu1 %v299_v0 }
  0x15   :  { %286 = vmatpush3.bf16.msra.mxu1 %v285_v20 }
  0x16   :  { %287 = vmatprep.subr.bf16.mxu1 %v299_v0 }
  0x19   :  { %289 = vmatpush3.bf16.msra.mxu1 %v288_v23 }
  0x1a   :  { %290 = vmatprep.subr.bf16.mxu1 %v299_v0 }
  0x1d   :  { %292 = vmatpush3.bf16.msra.mxu1 %v291_v26 }
  0x1e   :  { %293 = vmatprep.subr.bf16.mxu1 %v299_v0 }
  0x21   :  { %295 = vmatpush3.bf16.msra.mxu1 %v294_v29 }
  0xda   :  { %v100_v31 = vpop.f32.mrb[0].mxu0 }
  0xdb   :  { %v101_v32 = vadd.f32 %v204_v30, %v100_v31  ;;  %v233_v33 = vpop.f32.mrb[1].mxu0 }
  0xdd   :  { %v104_v34 = vmax.f32 %v101_v32, 0.0 }
  0xdf   :  { %267 = vmatmul.mubr.f32.vlgmr.msra.gmra.mrb[0].mxu1 %v104_v34 }
 0x1b2   :  { %v194_v36 = vpop.f32.mrb[0].mxu1 }
 0x1b3   :  { %v195_v37 = vadd.f32 %v206_v35, %v194_v36  ;;  %v268_v38 = vpop.f32.mrb[1].mxu1 }
 0x1b5   :  { %199 = vst.msk [vmem:[%s403_s5] sm:$0xff] %vm198_vm2, %v195_v37 }

</bundles_post_ra>
